<compile_context>
chip_gen: v5e
topology: v5e:2x2
jax: 0.10.0
libtpu: 0.0.40
codegen_flags: <defaults>
</compile_context>

<pallas_src>
import functools
import math

import numpy as np
import jax
import jax.numpy as jnp
from jax import lax
from jax.experimental import pallas as pl
from jax.experimental.pallas import tpu as pltpu

LANE = 128
SUBLANE = 8


def _round_up(x: int, m: int) -> int:
    return (x + m - 1) // m * m


# ------------------------------ kernel ------------------------------------- #

def _crop_kernel(params_ref, x_ref, o_ref):
    """Crop one (Hp, Wp) plane to (th, tw) starting at dynamic (top, left).

    params_ref : SMEM (2,) int32 = [top, left]   (scalar prefetch)
    x_ref      : VMEM (Hp, Wp) input plane (W padded to a multiple of 128)
    o_ref      : VMEM (th, tw) cropped output plane
    """
    top = params_ref[0]
    left = params_ref[1]
    th, tw = o_ref.shape            # static (module config `size`)
    wp = x_ref.shape[-1]            # static padded width

    # Row crop: dynamic sublane-offset slice (pure data movement).
    rows = x_ref[pl.ds(top, th), :]                       # (th, wp)

    # Column crop: rotate so the wanted window starts at lane 0, then take a
    # static lane slice.  jnp.roll semantics: rolled[:, j] = rows[:, (j + left) % wp].
    shift = (wp - left) % wp
    rolled = pltpu.roll(rows, shift, axis=1)              # XLU lane rotate
    o_ref[...] = rolled[:, :tw]


# ------------------------------ wrappers ------------------------------------ #

@functools.partial(jax.jit, static_argnums=(2, 3))
def _crop_planes(x3, params, th, tw):
    """x3: (L, Hp, Wp) padded planes; params: (2,) int32 [top, left]."""
    L, Hp, Wp = x3.shape
    return pl.pallas_call(
        _crop_kernel,
        out_shape=jax.ShapeDtypeStruct((L, th, tw), x3.dtype),
        grid_spec=pltpu.PrefetchScalarGridSpec(
            num_scalar_prefetch=1,
            grid=(L,),
            in_specs=[pl.BlockSpec((None, Hp, Wp), lambda i, p: (i, 0, 0))],
            out_specs=pl.BlockSpec((None, th, tw), lambda i, p: (i, 0, 0)),
        ),
        compiler_params=pltpu.CompilerParams(
            dimension_semantics=("parallel",),   # shard planes across v7x's 2 TCs
        ),
    )(params, x3)


def crop_image(x, top, left, th, tw):
    """Pallas crop: x[..., top:top+th, left:left+tw] for any leading dims/dtype."""
    th, tw = int(th), int(tw)
    was_bool = x.dtype == jnp.bool_
    if was_bool:                      # masks: crop as i32 (dtype-safe), cast back
        x = x.astype(jnp.int32)

    *lead, H, W = x.shape
    L = math.prod(lead) if lead else 1
    x3 = x.reshape(L, H, W)

    # Lane-dense padding (no-op when already (8,128)-aligned).
    Hp = _round_up(H, SUBLANE)
    Wp = _round_up(W, LANE)
    if (Hp, Wp) != (H, W):
        x3 = jnp.pad(x3, ((0, 0), (0, Hp - H), (0, Wp - W)))

    params = jnp.stack([jnp.asarray(top), jnp.asarray(left)]).astype(jnp.int32)
    out = _crop_planes(x3, params, th, tw)
    out = out.reshape(*lead, th, tw)
    if was_bool:
        out = out.astype(jnp.bool_)
    return out


# --------------------------- RandomCrop module ------------------------------ #

def get_image_size(sample, apply_keys):
    for image_key in ['image', 'image_ref', 'image_prime']:
        if image_key in sample and (len(apply_keys) == 0 or image_key in apply_keys):
            break
    else:
        raise ValueError
    h, w = sample[image_key].shape[-2:]
    return (w, h)


class RandomCrop:
    """JAX / Pallas-TPU equivalent of the PyTorch RandomCrop transform."""

    def __init__(self, apply_keys='all', size=None, ignore_index=255, cat_max_ratio=1.0):
        self.apply_keys = apply_keys
        self.size = size
        self.ignore_index = ignore_index
        self.cat_max_ratio = cat_max_ratio

    @staticmethod
    def get_params(img_size, output_size, key):
        h, w = img_size
        th, tw = output_size
        if w == tw and h == th:
            return (jnp.asarray(0, jnp.int32), jnp.asarray(0, jnp.int32), h, w)
        ki, kj = jax.random.split(key)
        i = jax.random.randint(ki, (), 0, max(h - th, 0) + 1, dtype=jnp.int32)
        j = jax.random.randint(kj, (), 0, max(w - tw, 0) + 1, dtype=jnp.int32)
        return (i, j, min(th, h), min(tw, w))

    @staticmethod
    def _plain_crop(img, top, left, height, width):
        # Eager-JAX crop used only by the (host-side) cat_max_ratio retry loop.
        img = lax.dynamic_slice_in_dim(img, top, height, axis=img.ndim - 2)
        img = lax.dynamic_slice_in_dim(img, left, width, axis=img.ndim - 1)
        return img

    def crop(self, img, top, left, height, width):
        h, w = img.shape[-2:]
        if height > h or width > w:
            raise ValueError(
                'Invalid crop parameters: {}, img size: {}'.format(
                    (top, left, height, width), (h, w)))
        return crop_image(img, top, left, height, width)

    def adjust_correspondences(self, pts1, pts2, crop_params):
        top, left, height, width = crop_params
        shift = jnp.stack([jnp.asarray(left), jnp.asarray(top)]).astype(pts1.dtype)
        pts1 = pts1 - shift
        pts2 = pts2 - shift

        def _in(p):
            rx, ry = jnp.round(p[:, 0]), jnp.round(p[:, 1])
            return (rx >= 0) & (rx < width) & (ry >= 0) & (ry < height)

        in_im = _in(pts1) & _in(pts2)
        # TODO(synk): dynamically-sized boolean filtering has no fixed-shape
        # Pallas/TPU equivalent; done in eager JAX like the host-side original.
        return pts1[in_im], pts2[in_im]

    def __call__(self, sample, key):
        if self.apply_keys == 'all':
            apply_keys = list(sample)
        else:
            apply_keys = self.apply_keys

        w, h = get_image_size(sample, apply_keys)
        k_params, k_retry = jax.random.split(key)
        crop_params = self.get_params([h, w], self.size, k_params)

        if self.cat_max_ratio < 1.0:
            retry_keys = jax.random.split(k_retry, 10)
            for t in range(10):
                seg_tmp = self._plain_crop(sample['semantic'], *crop_params)
                labels, cnt = jnp.unique(seg_tmp, return_counts=True)
                cnt = cnt[labels != self.ignore_index]
                if cnt.shape[0] > 1 and float(cnt.max()) / float(jnp.sum(cnt)) < self.cat_max_ratio:
                    break
                crop_params = self.get_params([h, w], self.size, retry_keys[t])

        out = dict(sample)
        for k in apply_keys:
            val = sample[k]
            if k in ['image', 'image_ref', 'image_prime', 'semantic', 'normalize_mask']:
                out[k] = self.crop(val, *crop_params)
            elif k in ['corr_pts']:
                pts1, pts2 = self.adjust_correspondences(
                    sample['corr_pts_ref'], sample['corr_pts'], crop_params)
                out['corr_pts_ref'] = pts1
                out['corr_pts'] = pts2
            elif k in ['filename', 'image_prime_idx', 'corr_pts_ref']:
                pass
            else:
                raise ValueError(k)
        return out


# --------------------------------- main ------------------------------------- #

if __name__ == "__main__":
    key = jax.random.PRNGKey(0)
    k_img, k_sem, k_pts1, k_pts2, k_crop = jax.random.split(key, 5)

    N, C, H, W = 2, 4, 128, 128          # lane-dense spatial dims (W % 128 == 0)
    P = 8
    size = (80, 96)                      # (crop_h, crop_w)

    image = jax.random.normal(k_img, (N, C, H, W), dtype=jnp.float32)
    semantic = jax.random.randint(k_sem, (1, H, W), 0, 19, dtype=jnp.int32)
    corr_pts = jax.random.uniform(k_pts1, (P, 2), jnp.float32, 0.0, float(W - 1))
    corr_pts_ref = jax.random.uniform(k_pts2, (P, 2), jnp.float32, 0.0, float(W - 1))

    sample = {
        "image": image,
        "semantic": semantic,
        "corr_pts": corr_pts,
        "corr_pts_ref": corr_pts_ref,
        "filename": "synthetic.png",
    }

    transform = RandomCrop(apply_keys="all", size=size)
    out = transform(sample, k_crop)
    jax.block_until_ready(out["image"])
    jax.block_until_ready(out["semantic"])

    # ---------------- reference checks (plain JAX / numpy) ------------------ #
    # Recreate the crop parameters from the same key split used inside __call__.
    k_params, _ = jax.random.split(k_crop)
    top, left, th, tw = RandomCrop.get_params([H, W], size, k_params)
    t, l = int(top), int(left)

    ref_img = image[..., t:t + th, l:l + tw]
    ref_sem = semantic[..., t:t + th, l:l + tw]
    assert out["image"].shape == (N, C, th, tw)
    assert jnp.array_equal(out["image"], ref_img), "image crop mismatch"
    assert jnp.array_equal(out["semantic"], ref_sem), "semantic crop mismatch"

    p1 = np.asarray(corr_pts_ref) - np.array([l, t], np.float32)
    p2 = np.asarray(corr_pts) - np.array([l, t], np.float32)
    rnd = np.round
    in_im = ((rnd(p1[:, 0]) >= 0) & (rnd(p1[:, 0]) < tw)
             & (rnd(p2[:, 0]) >= 0) & (rnd(p2[:, 0]) < tw)
             & (rnd(p1[:, 1]) >= 0) & (rnd(p1[:, 1]) < th)
             & (rnd(p2[:, 1]) >= 0) & (rnd(p2[:, 1]) < th))
    ref_p1, ref_p2 = p1[in_im], p2[in_im]
    assert np.allclose(np.asarray(out["corr_pts_ref"]), ref_p1, atol=1e-6)
    assert np.allclose(np.asarray(out["corr_pts"]), ref_p2, atol=1e-6)
    assert out["filename"] == "synthetic.png"

    # A second crop position reuses the same compiled kernel (scalar prefetch:
    # (top, left) are runtime values, so no retrace).
    out2 = transform(sample, jax.random.PRNGKey(7))
    jax.block_until_ready(out2["image"])
    k_params2, _ = jax.random.split(jax.random.PRNGKey(7))
    top2, left2, _, _ = RandomCrop.get_params([H, W], size, k_params2)
    t2, l2 = int(top2), int(left2)
    assert jnp.array_equal(out2["image"], image[..., t2:t2 + th, l2:l2 + tw])

    print("KERNEL_OK")
</pallas_src>

<mosaic_0001>
module attributes {stable_mosaic.version = 11 : i64} {
  func.func @_crop_kernel(%arg0: i32, %arg1: memref<2xi32, #tpu.memory_space<smem>>, %arg2: memref<1x128x128xf32, #tpu.memory_space<vmem>>, %arg3: memref<1x80x96xf32, #tpu.memory_space<vmem>>) attributes {dimension_semantics = [#tpu.dimension_semantics<parallel>], iteration_bounds = array<i64: 8>, scalar_prefetch = 1 : i64, scratch_operands = 0 : i64, tpu.core_type = #tpu.core_type<tc>, window_params = [{transform_indices = @transform_0, window_bounds = array<i64: 1, 128, 128>}, {transform_indices = @transform_1, window_bounds = array<i64: 1, 80, 96>}]} {
    %c0 = arith.constant 0 : index
    %0 = memref.load %arg1[%c0] : memref<2xi32, #tpu.memory_space<smem>>
    %c1 = arith.constant 1 : index
    %1 = memref.load %arg1[%c1] : memref<2xi32, #tpu.memory_space<smem>>
    %c0_0 = arith.constant 0 : index
    %2 = arith.index_cast %0 : i32 to index
    %c0_1 = arith.constant 0 : index
    %3 = vector.load %arg2[%c0_0, %2, %c0_1] : memref<1x128x128xf32, #tpu.memory_space<vmem>>, vector<1x80x128xf32>
    %4 = vector.shape_cast %3 : vector<1x80x128xf32> to vector<80x128xf32>
    %c128_i32 = arith.constant 128 : i32
    %5 = arith.subi %c128_i32, %1 : i32
    %c128_i32_2 = arith.constant 128 : i32
    %c0_i32 = arith.constant 0 : i32
    %6 = arith.cmpi eq, %c128_i32_2, %c0_i32 : i32
    %c1_i32 = arith.constant 1 : i32
    %7 = arith.select %6, %c1_i32, %c128_i32_2 : i32
    %8 = arith.remsi %5, %7 : i32
    %c0_i32_3 = arith.constant 0 : i32
    %9 = arith.cmpi ne, %8, %c0_i32_3 : i32
    %c0_i32_4 = arith.constant 0 : i32
    %10 = arith.cmpi slt, %8, %c0_i32_4 : i32
    %c0_i32_5 = arith.constant 0 : i32
    %11 = arith.cmpi slt, %7, %c0_i32_5 : i32
    %12 = arith.xori %10, %11 : i1
    %13 = arith.andi %12, %9 : i1
    %14 = arith.addi %8, %7 : i32
    %15 = arith.select %13, %14, %8 : i32
    %16 = tpu.dynamic_rotate %4 by %15 dim 1 : vector<80x128xf32>, i32 -> vector<80x128xf32>
    %17 = vector.extract_strided_slice %16 {offsets = [0, 0], sizes = [80, 96], strides = [1, 1]} : vector<80x128xf32> to vector<80x96xf32>
    %c0_6 = arith.constant 0 : index
    %c0_7 = arith.constant 0 : index
    %c0_8 = arith.constant 0 : index
    %18 = vector.load %arg3[%c0_6, %c0_7, %c0_8] : memref<1x80x96xf32, #tpu.memory_space<vmem>>, vector<1x80x96xf32>
    %19 = vector.shape_cast %18 : vector<1x80x96xf32> to vector<80x96xf32>
    %20 = vector.shape_cast %17 : vector<80x96xf32> to vector<1x80x96xf32>
    tpu.vector_store %arg3[%c0_6, %c0_7, %c0_8], %20 {strides = array<i32>} : memref<1x80x96xf32, #tpu.memory_space<vmem>>, vector<1x80x96xf32>,
    return
  }
  func.func @transform_0(%arg0: i32, %arg1: memref<2xi32, #tpu.memory_space<smem>>) -> (i32, i32, i32) {
    %c0_i32 = arith.constant 0 : i32
    %c0_i32_0 = arith.constant 0 : i32
    %c0_i32_1 = arith.constant 0 : i32
    return %arg0, %c0_i32, %c0_i32_0 : i32, i32, i32
  }
  func.func @transform_1(%arg0: i32, %arg1: memref<2xi32, #tpu.memory_space<smem>>) -> (i32, i32, i32) {
    %c0_i32 = arith.constant 0 : i32
    %c0_i32_0 = arith.constant 0 : i32
    %c0_i32_1 = arith.constant 0 : i32
    return %arg0, %c0_i32, %c0_i32_0 : i32, i32, i32
  }
}

</mosaic_0001>

<bundles_post_ra>
// kernel: _crop_planes.1
= control target key start
LH: loop header
LB: loop body
LE: loop exit
PB: predicated region body
PF: predicated region fallthrough
CT: control target
= control target key end

     0   :  { %s476_s12 = smov [#allocation3]   ;;  %s635_s0 = inlined_call_operand.hbm [shape: s32[2], index: 0, kind: input, shape index: {}]   ;;  %s636_s1 = inlined_call_operand.hbm [shape: f32[8,128,128], index: 1, kind: input, shape index: {}]   ;;  %s637_s2 = inlined_call_operand.hbm [shape: f32[8,80,96], index: 2, kind: output, shape index: {}]  }
   0x1   :  { %s8_s11 = sshll.u32 %s635_s0, 4  ;;  %s9_s11 = int_to_ptr.hbm [resolvable:$true] %s8_s11 }
   0x2   :  { %11 = dma.hbm_to_smem %s9_s11, 16, %s476_s12, [#allocation2] }
   0x3   :  { %450 = dma.done.wait [#allocation2], 16 }
   0x4   :  { %451 = vsyncadd [#allocation2], 4294967280 }
   0x5   :  { %14 = sfence }
   0x6   :  { %15 = vsyncpa [#allocation5], 0 }
   0x7   :  { %17 = vsyncpa [#allocation5 + $0x1], 0 }
   0x8   :  { %18 = vsyncpa [#allocation6], 0 }
   0x9   :  { %20 = vsyncpa [#allocation6 + $0x1], 0  ;;  %s499_s13 = smov 0   ;;  %s501_s14 = smov 0  }
   0xa   :  { %s503_s15 = smov 0   ;;  %s505_s16 = smov 0  }
   0xb LB: > { %s520_s0 = sadd.s32 4294967295, %s474_s16   ;;  %s295_s17 = sadd.s32 4294967294, %s474_s16   ;;  %s474_s16 = sphi %s505_s16, %s646_s16   ;;  %s470_s15 = sphi %s503_s15, %s645_s15   ;;  %s466_s14 = sphi %s501_s14, %s644_s14   ;;  %s462_s13 = sphi %s499_s13, %s643_s13  }
   0xc   : > { %s524_s18 = sadd.s32 1, %s474_s16   ;;  %s33_s19 = sadd.s32 1, %s470_s15 }
   0xd   : > { %s30_s20 = ssub.s32 %s474_s16, %s524_s18  ;;  %p40_p0 = scmp.ne.s32.totalorder %s470_s15, %s466_s14 }
   0xe   : > { %p31_p1 = scmp.eq.s32.totalorder %s30_s20, 0  ;;  %p41_p2 = scmp.eq.s32.totalorder %s474_s16, 0 }
   0xf   : > { %p46_p3 = scmp.ne.s32.totalorder %s466_s14, %s462_s13  ;;  %p47_p4 = scmp.eq.s32.totalorder %s520_s0, 0 }
  0x10   : > { %s536_s21 = scalar_select %p31_p1, %s470_s15, %s33_s19  }
  0x11   : > { %p538_p5 = por %p41_p2, %p40_p0  ;;  %p542_p6 = por %p47_p4, %p46_p3 }
  0x12   : > { %p70_p7 = scmp.eq.s32.totalorder %s520_s0, 7  ;;  %p76_p8 = scmp.eq.s32.totalorder %s295_s17, 7 }
  0x13   : > { %p325_p9 = scmp.lt.s32.totalorder %s474_s16, 8  ;;  %s96_s26 = sand.u32 1, %s470_s15  }
  0x14   : > { %p548_p10 = por %p70_p7, %p40_p0  ;;  %p552_p11 = por %p76_p8, %p46_p3 }
  0x15   : > { %s310_s27 = sshll.u32 %s474_s16, 7  ;;  %s298_s28 = sshll.u32 %s96_s26, 7 }
  0x16   : > { %s105_s3 = scalar_lea.hbm %s636_s1, %s310_s27  ;;  %s100_s5 = scalar_lea.vmem [#allocation4], %s298_s28 }
  0x17   : > { %s106_s4 = sshll.u32 %s105_s3, 4  ;;  %s108_s6 = sshll.u32 %s100_s5, 4  ;;  %s107_s4 = int_to_ptr.hbm [resolvable:$true] %s106_s4  ;;  %s109_s6 = int_to_ptr.vmem [resolvable:$true] %s108_s6 }
  0x18   : > { %p563_p12 = pnand %p325_p9, %p538_p5  ;;  %p301_p13 = scmp.ge.s32.totalorder %s474_s16, 1 }
  0x19   : > { %p116_p0 = scmp.lt.s32.totalorder %s474_s16, 9  ;;  %s97_s8 = scalar_lea.sflag [#allocation5], %s96_s26 }
  0x1a   : > { %s376_s9 = sshra.s32 %s107_s4, 4  ;;  %p380_p2 = pneg %p563_p12  ;;  %s377_s9 = int_to_ptr.hbm [resolvable:$true] %s376_s9 }
  0x1b   : > { %s378_s10 = scalar_lea.hbm %s377_s9, 128  ;;  %s383_s17 = scalar_lea.hbm %s636_s1, 1024 }
  0x1c   : > { %p379_p1 = scmp.ne.s32.totalorder %s377_s9, %s378_s10  ;;  %p384_p5 = scmp.lt.s32.totalorder %s377_s9, %s636_s1 }
  0x1d   : > { %p385_p7 = scmp.lt.s32.totalorder %s383_s17, %s378_s10 }
  0x1e   : > { %p381_p3 = pnand %p380_p2, %p379_p1 }
  0x1f   : > { %p386_p8 = por %p385_p7, %p384_p5 }
  0x20   : > { %p382_p4 = pneg %p381_p3 }
  0x22   : > { %p387_p9 = pnand %p386_p8, %p382_p4 }
  0x24   : > { %390 = shalt.err (!%p387_p9)
}
  0x25   : > { %s477_s22 = smov 128   ;;  %s478_s26 = smov 8  }
  0x26   : > { %320 = dma.hbm_to_vmem [thread:$0]  (!%p563_p12), %s107_s4, 2048, %s109_s6, %s97_s8, %s477_s22, %s477_s22, %s478_s26  }
  0x27   : > { %p117_p1 = pnand %p301_p13, %p116_p0 }
  0x28   : > { %s584_s27 = sand.u32 (!%p117_p1), 1, %s466_s14  }
  0x29   : > { %120 = sbr.rel (%p117_p1) target bundleno = 206 (0xce), region = 24  ;;  %s302_s28 = sshll.u32 (!%p117_p1), %s584_s27, 7 }
  0x2a   : > { %s123_s29 = scalar_lea.sflag (!%p117_p1), [#allocation5], %s584_s27  ;;  %s126_s30 = scalar_lea.vmem (!%p117_p1), [#allocation4], %s302_s28 }
  0x2e   : > { %453 = dma.done.wait (%p542_p6), %s123_s29, 2048  }
  0x2f   : > { %455 = vsyncadd (%p542_p6), %s123_s29, 4294965248  ;;  %s303_s3 = sld [smem:[#allocation3 + $0x1]]  ;;  %s311_s23 = smul.u32 80, %s584_s27  ;;  %vm194_vm0 = vcmask 785408  }
  0x30   : > { %s146_s4 = sld [smem:[#allocation3]]  ;;  %s312_s19 = smul.u32 80, %s520_s0 }
  0x31   : > { %s145_s17 = scalar_lea.vmem [#allocation7], %s311_s23 }
  0x32   : > { %s217_s26 = scalar_lea.hbm %s637_s2, %s312_s19  ;;  %s218_s28 = sshll.u32 %s145_s17, 4  ;;  %s219_s28 = int_to_ptr.vmem [resolvable:$true] %s218_s28 }
  0x33   : > { %s220_s29 = sshll.u32 %s217_s26, 4  ;;  %s221_s29 = int_to_ptr.hbm [resolvable:$true] %s220_s29 }
  0x34   : > { %s420_s0 = sshra.s32 %s221_s29, 4  ;;  %s421_s0 = int_to_ptr.hbm [resolvable:$true] %s420_s0 }
  0x35   : > { %s159_s5 = ssub.s32 128, %s303_s3  ;;  %s422_s3 = scalar_lea.hbm %s421_s0, 80 }
  0x36   : > { %p160_p12 = scmp.lt.s32.totalorder %s159_s5, 0  ;;  %s161_s6 = ssub.s32 0, %s159_s5 }
  0x37   : > { %s304_s7 = smin.u32 %s161_s6, %s159_s5  ;;  %s148_s10 = scalar_lea.vmem %s126_s30, %s146_s4 [#allocation4] }
  0x38   : > { %s163_s8 = sand.u32 127, %s304_s7   ;;  %v149_v0 = vld [vmem:[%s148_s10] sm:$0xff]  ;;  %v151_v1 = vld [vmem:[%s148_s10 + $0x10] sm:$0xff]  ;;  %v150_v3 = vld [vmem:[%s148_s10 + $0x8] sm:$0xff]  ;;  %s206_s30 = scalar_lea.sflag [#allocation6], %s584_s27 }
  0x39   : > { %s164_s9 = ssub.s32 0, %s163_s8  ;;  %v153_v2 = vld [vmem:[%s148_s10 + $0x20] sm:$0xff]  ;;  %v152_v4 = vld [vmem:[%s148_s10 + $0x18] sm:$0xff]  ;;  %v154_v5 = vld [vmem:[%s148_s10 + $0x28] sm:$0xff]  ;;  %p423_p6 = scmp.ne.s32.totalorder %s421_s0, %s422_s3 }
  0x3a   : > { %s648_s9 = smov (!%p160_p12, %s164_s9), %s163_s8  ;;  %v155_v6 = vld [vmem:[%s148_s10 + $0x30] sm:$0xff]  ;;  %v156_v7 = vld [vmem:[%s148_s10 + $0x38] sm:$0xff]  ;;  %v157_v8 = vld [vmem:[%s148_s10 + $0x40] sm:$0xff]  ;;  %s426_s6 = scalar_lea.hbm %s637_s2, 640 }
  0x3b   : > { %p306_p13 = scmp.lt.s32.totalorder %s648_s9, 0  ;;  %s170_s11 = sadd.s32 128, %s648_s9  ;;  %v158_v9 = vld [vmem:[%s148_s10 + $0x48] sm:$0xff] }
  0x3c   : > { %p424_p0 = pnand %p423_p6, %p548_p10  ;;  %p427_p3 = scmp.lt.s32.totalorder %s421_s0, %s637_s2 }
  0x3d   : > { %s650_s11 = smov (!%p306_p13, %s170_s11), %s648_s9  ;;  %p428_p4 = scmp.lt.s32.totalorder %s426_s6, %s422_s3 }
  0x3e   : > { %s172_s12 = sand.u32 127, %s650_s11   ;;  %p425_p2 = pneg %p424_p0 }
  0x3f   : > { %174 = vrot.lane.b32.xlu0 %v149_v0, %s172_s12  ;;  %178 = vrot.lane.b32.xlu1 %v151_v1, %s172_s12  ;;  %p429_p5 = por %p428_p4, %p427_p3 }
  0x40   : > { %182 = vrot.lane.b32.xlu2 %v153_v2, %s172_s12 }
  0x41   : > { %p430_p7 = pnand %p429_p5, %p425_p2 }
  0x47   : > { %176 = vrot.lane.b32.xlu0 %v150_v3, %s172_s12  ;;  %180 = vrot.lane.b32.xlu1 %v152_v4, %s172_s12 }
  0x48   : > { %184 = vrot.lane.b32.xlu2 %v154_v5, %s172_s12 }
  0x4f   : > { %186 = vrot.lane.b32.xlu0 %v155_v6, %s172_s12  ;;  %188 = vrot.lane.b32.xlu1 %v156_v7, %s172_s12 }
  0x50   : > { %190 = vrot.lane.b32.xlu2 %v157_v8, %s172_s12 }
  0x57   : > { %192 = vrot.lane.b32.xlu0 %v158_v9, %s172_s12 }
  0x9a   : > { %v183_v10 = vpop.permute.xlu2 %182 }
  0x9b   : > { %199 = vst.msk [vmem:[%s145_s17 + $0x20] sm:$0xff] %vm194_vm0, %v183_v10 }
  0xa2   : > { %v185_v11 = vpop.permute.xlu2 %184 }
  0xa3   : > { %200 = vst.msk [vmem:[%s145_s17 + $0x28] sm:$0xff] %vm194_vm0, %v185_v11 }
  0xaa   : > { %v191_v12 = vpop.permute.xlu2 %190 }
  0xab   : > { %203 = vst.msk [vmem:[%s145_s17 + $0x40] sm:$0xff] %vm194_vm0, %v191_v12 }
  0xb1   : > { %v175_v13 = vpop.permute.xlu0 %174  ;;  %v179_v14 = vpop.permute.xlu1 %178 }
  0xb2   : > { %195 = vst.msk [vmem:[%s145_s17] sm:$0xff] %vm194_vm0, %v175_v13 }
  0xb3   : > { %197 = vst.msk [vmem:[%s145_s17 + $0x10] sm:$0xff] %vm194_vm0, %v179_v14 }
  0xb9   : > { %v177_v15 = vpop.permute.xlu0 %176  ;;  %v181_v16 = vpop.permute.xlu1 %180 }
  0xba   : > { %196 = vst.msk [vmem:[%s145_s17 + $0x8] sm:$0xff] %vm194_vm0, %v177_v15 }
  0xbb   : > { %198 = vst.msk [vmem:[%s145_s17 + $0x18] sm:$0xff] %vm194_vm0, %v181_v16 }
  0xc1   : > { %v187_v17 = vpop.permute.xlu0 %186  ;;  %v189_v18 = vpop.permute.xlu1 %188 }
  0xc2   : > { %201 = vst.msk [vmem:[%s145_s17 + $0x30] sm:$0xff] %vm194_vm0, %v187_v17 }
  0xc3   : > { %202 = vst.msk [vmem:[%s145_s17 + $0x38] sm:$0xff] %vm194_vm0, %v189_v18 }
  0xc9   : > { %v193_v19 = vpop.permute.xlu0 %192 }
  0xca   : > { %204 = vst.msk [vmem:[%s145_s17 + $0x48] sm:$0xff] %vm194_vm0, %v193_v19 }
  0xcb   : > { %433 = shalt.err (!%p430_p7)
}
  0xcc   : > { %s479_s27 = smov 128   ;;  %s480_s9 = smov 8  }
  0xcd   : > { %315 = dma.vmem_to_hbm [thread:$0]  (%p548_p10), %s219_s28, 1280, %s221_s29, %s206_s30, %s479_s27, %s479_s27, %s480_s9  }
  0xce PF: > { %p326_p8 = scmp.ge.s32.totalorder %s474_s16, 2  ;;  %s235_s10 = sand.u32 1, %s462_s13  }
  0xcf   : > { %s236_s11 = scalar_lea.sflag [#allocation6], %s235_s10 }
  0xd0   : > { %p322_p9 = pnand %p326_p8, %p552_p11 }
  0xd2   : > { %p323_p1 = pneg %p322_p9 }
  0xd4   : > { %457 = dma.done.wait (%p323_p1), %s236_s11, 1280  }
  0xd5   : > { %459 = vsyncadd (%p323_p1), %s236_s11, 4294966016  ;;  %p23_p12 = scmp.ge.s32.totalorder %s524_s18, 10   ;;  %s643_s13 = smov %s466_s14 }
  0xd6   : > { %s644_s14 = smov %s470_s15  ;;  %s645_s15 = smov %s536_s21 }
  0xd7   : > { %s646_s16 = smov %s524_s18  ;;  %25 = sbr.rel (!%p23_p12) target bundleno = 11 (0xb), region = 70 }
  0xdc   :  { %242 = vsyncpa [#allocation5], 1 }
  0xdd   :  { %244 = vsyncpa [#allocation5 + $0x1], 1 }
  0xde   :  { %245 = vsyncpa [#allocation6], 1 }
  0xdf   :  { %247 = vsyncpa [#allocation6 + $0x1], 1 }

</bundles_post_ra>
